<compile_context>
chip_gen: v5e
topology: v5e:2x2
jax: 0.10.0
libtpu: 0.0.40
codegen_flags: <defaults>
</compile_context>

<pallas_src>
from functools import partial

import jax
import jax.numpy as jnp
from jax.experimental import pallas as pl
from jax.experimental.pallas import tpu as pltpu

LANE = 128          # MXU / vreg lane width
SUBLANE = 8         # f32 sublane height
MAX_ROW_TILE = 256  # row tile for large graphs (VMEM-safe on v7x)


def _round_up(x, m):
    return (x + m - 1) // m * m


# ----------------------------- Pallas kernel -------------------------------

def fused_gcn_kernel(a_ref, x_ref, w1_ref, b1_ref, w2_ref, b2_ref, o_ref,
                     xw_ref, hw_ref):
    """Two fused GCNConv layers over a 3-phase grid (phase, row_tile).

    phase 0:  xw[rows]  = X[rows] @ W1                       (transform 1)
    phase 1:  h         = relu(A_hat[rows, :] @ xw + b1)     (propagate 1)
              hw[rows]  = h @ W2                             (transform 2)
    phase 2:  out[rows] = A_hat[rows, :] @ hw + b2           (propagate 2)

    a_ref  : [TM, Np]     bf16 normalized-adjacency row tile
    x_ref  : [TM, Fin_p]  f32 node-feature row tile
    w*/b*  : lane-padded f32 weights / biases (resident, index (0,0))
    o_ref  : [TM, Fout_p] output row tile
    xw_ref : [Np, Hid_p]  VMEM scratch (persists across grid steps)
    hw_ref : [Np, Fout_p] VMEM scratch (persists across grid steps)
    """
    phase = pl.program_id(0)
    i = pl.program_id(1)
    tm = x_ref.shape[0]
    row0 = pl.multiple_of(i * tm, tm)

    @pl.when(phase == 0)
    def _():
        xw_ref[pl.ds(row0, tm), :] = jnp.dot(
            x_ref[...], w1_ref[...], preferred_element_type=jnp.float32)

    @pl.when(phase == 1)
    def _():
        h = jnp.dot(a_ref[...].astype(jnp.float32), xw_ref[...],
                    preferred_element_type=jnp.float32) + b1_ref[...]
        h = jnp.maximum(h, 0.0)
        # F.dropout(p=0.5, training=False) is the identity in eval mode.
        # TODO(synk): training-mode dropout would need torch-RNG parity.
        hw_ref[pl.ds(row0, tm), :] = jnp.dot(
            h, w2_ref[...], preferred_element_type=jnp.float32)

    @pl.when(phase == 2)
    def _():
        o_ref[...] = (jnp.dot(a_ref[...].astype(jnp.float32), hw_ref[...],
                              preferred_element_type=jnp.float32)
                      + b2_ref[...]).astype(o_ref.dtype)


def fused_gcn_call(a_p, x_p, w1p, b1p, w2p, b2p, *, tm):
    n_pad = a_p.shape[0]
    fin_p = x_p.shape[1]
    hid_p = w1p.shape[1]
    fout_p = w2p.shape[1]
    nt = n_pad // tm

    # Conditional index maps (pure scalar int arithmetic): stream A_hat only
    # during the two propagation phases, X only during phase 0, and only
    # advance output blocks once phase 2 actually writes them (no garbage
    # writebacks, no redundant DMA).
    def a_map(p, i):
        return (i * jnp.minimum(p, 1), 0)            # phase 0 -> block 0

    def x_map(p, i):
        return (i * (1 - jnp.minimum(p, 1)), 0)      # phases 1,2 -> block 0

    def o_map(p, i):
        return (i * jnp.maximum(p - 1, 0), 0)        # phases 0,1 -> block 0

    def const_map(p, i):
        return (0, 0)

    flops = 2 * (n_pad * fin_p * hid_p        # X @ W1
                 + n_pad * n_pad * hid_p      # A @ XW
                 + n_pad * hid_p * fout_p     # h @ W2
                 + n_pad * n_pad * fout_p)    # A @ HW
    bytes_accessed = (2 * a_p.size * a_p.dtype.itemsize   # A streamed twice
                      + x_p.size * x_p.dtype.itemsize
                      + (w1p.size + b1p.size + w2p.size + b2p.size) * 4
                      + n_pad * fout_p * 4)

    return pl.pallas_call(
        fused_gcn_kernel,
        out_shape=jax.ShapeDtypeStruct((n_pad, fout_p), jnp.float32),
        grid_spec=pltpu.PrefetchScalarGridSpec(
            num_scalar_prefetch=0,
            grid=(3, nt),
            in_specs=[
                pl.BlockSpec((tm, n_pad), a_map),        # A_hat row tile
                pl.BlockSpec((tm, fin_p), x_map),        # X row tile
                pl.BlockSpec((fin_p, hid_p), const_map),  # W1 (resident)
                pl.BlockSpec((1, hid_p), const_map),      # b1
                pl.BlockSpec((hid_p, fout_p), const_map),  # W2
                pl.BlockSpec((1, fout_p), const_map),      # b2
            ],
            out_specs=pl.BlockSpec((tm, fout_p), o_map),
            scratch_shapes=[
                pltpu.VMEM((n_pad, hid_p), jnp.float32),   # X @ W1
                pltpu.VMEM((n_pad, fout_p), jnp.float32),  # relu(.) @ W2
            ],
        ),
        compiler_params=pltpu.CompilerParams(
            # Phases carry a dependency through per-core VMEM scratch, so
            # neither axis may be megacore-sharded.
            dimension_semantics=("arbitrary", "arbitrary")),
        cost_estimate=pl.CostEstimate(
            flops=flops, transcendentals=0, bytes_accessed=bytes_accessed),
    )(a_p, x_p, w1p, b1p, w2p, b2p)


# ------------------------- per-graph / per-model prep ------------------------

def normalized_adjacency(edge_index, num_nodes):
    """Dense D^{-1/2}(A+I)D^{-1/2}, matching PyG gcn_norm (add_self_loops=True)."""
    src, dst = edge_index[0], edge_index[1]
    loop = jnp.arange(num_nodes, dtype=edge_index.dtype)
    src = jnp.concatenate([src, loop])
    dst = jnp.concatenate([dst, loop])
    # A[i, j] = (number of) edges j -> i, self loops included.
    a = jnp.zeros((num_nodes, num_nodes), jnp.float32).at[dst, src].add(1.0)
    deg = a.sum(axis=1)                              # in-degree incl. self loop
    d_inv_sqrt = jnp.where(deg > 0, 1.0 / jnp.sqrt(deg), 0.0)
    return d_inv_sqrt[:, None] * a * d_inv_sqrt[None, :]


def prepare_graph(edge_index, num_nodes, *, max_row_tile=MAX_ROW_TILE):
    """Build the padded bf16 adjacency ONCE per graph; cache across forwards."""
    a = normalized_adjacency(edge_index, num_nodes)
    n_pad = _round_up(num_nodes, SUBLANE)
    if n_pad <= max_row_tile:
        tm = n_pad
    else:
        tm = max_row_tile
        n_pad = _round_up(n_pad, tm)
    a_p = jnp.zeros((n_pad, n_pad), jnp.bfloat16)
    a_p = a_p.at[:num_nodes, :num_nodes].set(a.astype(jnp.bfloat16))
    return a_p, tm


def _pad2d(x, shape):
    return jnp.pad(x, [(0, s - d) for d, s in zip(x.shape, shape)])


def prepare_params(params):
    """Zero-pad weights / biases so every feature dim is lane-dense (x128)."""
    w1, b1, w2, b2 = params["w1"], params["b1"], params["w2"], params["b2"]
    fin_p = _round_up(w1.shape[0], LANE)
    hid_p = _round_up(w1.shape[1], LANE)
    out_p = _round_up(w2.shape[1], LANE)
    return {
        "w1": _pad2d(w1, (fin_p, hid_p)),
        "b1": _pad2d(b1.reshape(1, -1), (1, hid_p)),
        "w2": _pad2d(w2, (hid_p, out_p)),
        "b2": _pad2d(b2.reshape(1, -1), (1, out_p)),
    }


def gcn_forward(a_hat_p, params_p, x, *, tm, out_c):
    """Eval-mode GCN forward; a_hat_p / params_p come from prepare_*()."""
    n, in_c = x.shape
    n_pad = a_hat_p.shape[0]
    fin_p = params_p["w1"].shape[0]
    x_p = jnp.zeros((n_pad, fin_p), jnp.float32).at[:n, :in_c].set(x)
    out_p = fused_gcn_call(a_hat_p, x_p, params_p["w1"], params_p["b1"],
                           params_p["w2"], params_p["b2"], tm=tm)
    return out_p[:n, :out_c]


# --------------------------------- init --------------------------------------

def _glorot(key, shape):
    fan_in, fan_out = shape
    limit = jnp.sqrt(6.0 / (fan_in + fan_out))
    return jax.random.uniform(key, shape, jnp.float32, -limit, limit)


def init_gcn_params(in_channels, hidden_channels, out_channels, seed=42):
    # TODO(synk): torch.manual_seed(42) GCNConv init is not bit-reproducible in
    # JAX; same glorot-uniform scheme, different RNG stream.
    k1, k2 = jax.random.split(jax.random.PRNGKey(seed))
    return {
        "w1": _glorot(k1, (in_channels, hidden_channels)),
        "b1": jnp.zeros((hidden_channels,), jnp.float32),
        "w2": _glorot(k2, (hidden_channels, out_channels)),
        "b2": jnp.zeros((out_channels,), jnp.float32),
    }


# --------------------------------- main --------------------------------------

if __name__ == "__main__":
    N, IN_C, HID_C, OUT_C, E = 16, 8, 32, 4, 40

    key = jax.random.PRNGKey(0)
    kx, ke = jax.random.split(key)
    x = jax.random.normal(kx, (N, IN_C), jnp.float32)
    edge_index = jax.random.randint(ke, (2, E), 0, N, dtype=jnp.int32)

    params = init_gcn_params(IN_C, HID_C, OUT_C, seed=42)

    # Static per-graph / per-model preprocessing: done ONCE, cached.
    a_hat_p, tm = prepare_graph(edge_index, N)
    params_p = prepare_params(params)

    fwd = jax.jit(partial(gcn_forward, tm=tm, out_c=OUT_C))
    out = fwd(a_hat_p, params_p, x)
    jax.block_until_ready(out)

    # Pure-JAX reference using the exact bf16-quantized adjacency the kernel
    # consumes (all matmuls accumulate in f32, same as the kernel).
    a_q = a_hat_p[:N, :N].astype(jnp.float32)
    h_ref = jnp.maximum(a_q @ (x @ params["w1"]) + params["b1"], 0.0)
    ref = a_q @ (h_ref @ params["w2"]) + params["b2"]

    assert out.shape == (N, OUT_C)
    err = float(jnp.max(jnp.abs(out - ref)))
    assert err < 1e-4, f"max |out - ref| = {err}"

    print("KERNEL_OK")
</pallas_src>

<mosaic_0001>
module attributes {stable_mosaic.version = 11 : i64} {
  func.func @fused_gcn_kernel(%arg0: i32, %arg1: i32, %arg2: memref<16x16xbf16, #tpu.memory_space<vmem>>, %arg3: memref<16x128xf32, #tpu.memory_space<vmem>>, %arg4: memref<128x128xf32, #tpu.memory_space<vmem>>, %arg5: memref<1x128xf32, #tpu.memory_space<vmem>>, %arg6: memref<128x128xf32, #tpu.memory_space<vmem>>, %arg7: memref<1x128xf32, #tpu.memory_space<vmem>>, %arg8: memref<16x128xf32, #tpu.memory_space<vmem>>, %arg9: memref<16x128xf32, #tpu.memory_space<vmem>>, %arg10: memref<16x128xf32, #tpu.memory_space<vmem>>) attributes {dimension_semantics = [#tpu.dimension_semantics<arbitrary>, #tpu.dimension_semantics<arbitrary>], iteration_bounds = array<i64: 3, 1>, scalar_prefetch = 0 : i64, scratch_operands = 2 : i64, tpu.core_type = #tpu.core_type<tc>, window_params = [{transform_indices = @transform_0, window_bounds = array<i64: 16, 16>}, {transform_indices = @transform_1, window_bounds = array<i64: 16, 128>}, {pipeline_mode = #tpu.pipeline_mode<synchronous>, transform_indices = @transform_2, window_bounds = array<i64: 128, 128>}, {pipeline_mode = #tpu.pipeline_mode<synchronous>, transform_indices = @transform_3, window_bounds = array<i64: 1, 128>}, {pipeline_mode = #tpu.pipeline_mode<synchronous>, transform_indices = @transform_4, window_bounds = array<i64: 128, 128>}, {pipeline_mode = #tpu.pipeline_mode<synchronous>, transform_indices = @transform_5, window_bounds = array<i64: 1, 128>}, {transform_indices = @transform_6, window_bounds = array<i64: 16, 128>}]} {
    %c16_i32 = arith.constant 16 : i32
    %0 = arith.muli %arg1, %c16_i32 : i32
    %1 = tpu.assume_multiple %0, 16 : i32
    %c0_i32 = arith.constant 0 : i32
    %2 = arith.cmpi eq, %arg0, %c0_i32 : i32
    %3 = arith.extui %2 : i1 to i32
    %c0_i32_0 = arith.constant 0 : i32
    %4 = arith.cmpi ne, %3, %c0_i32_0 : i32
    scf.if %4 {
      %c0 = arith.constant 0 : index
      %c0_3 = arith.constant 0 : index
      %11 = vector.load %arg3[%c0, %c0_3] : memref<16x128xf32, #tpu.memory_space<vmem>>, vector<16x128xf32>
      %c0_4 = arith.constant 0 : index
      %c0_5 = arith.constant 0 : index
      %12 = vector.load %arg4[%c0_4, %c0_5] : memref<128x128xf32, #tpu.memory_space<vmem>>, vector<128x128xf32>
      %cst = arith.constant dense<0.000000e+00> : vector<16x128xf32>
      %13 = tpu.matmul %11, %12, %cst {dimension_numbers = #tpu.dot_dimension_numbers<[1], [0], [0], [1], [0, 0, 1, 1], [], []>} : vector<16x128xf32>, vector<128x128xf32>, vector<16x128xf32> -> vector<16x128xf32>
      %14 = arith.index_cast %1 : i32 to index
      %c0_6 = arith.constant 0 : index
      %15 = vector.load %arg9[%14, %c0_6] : memref<16x128xf32, #tpu.memory_space<vmem>>, vector<16x128xf32>
      tpu.vector_store %arg9[%14, %c0_6], %13 {strides = array<i32>} : memref<16x128xf32, #tpu.memory_space<vmem>>, vector<16x128xf32>,
    } else {
    }
    %c1_i32 = arith.constant 1 : i32
    %5 = arith.cmpi eq, %arg0, %c1_i32 : i32
    %6 = arith.extui %5 : i1 to i32
    %c0_i32_1 = arith.constant 0 : i32
    %7 = arith.cmpi ne, %6, %c0_i32_1 : i32
    scf.if %7 {
      %c0 = arith.constant 0 : index
      %c0_3 = arith.constant 0 : index
      %11 = vector.load %arg2[%c0, %c0_3] : memref<16x16xbf16, #tpu.memory_space<vmem>>, vector<16x16xbf16>
      %12 = arith.extf %11 : vector<16x16xbf16> to vector<16x16xf32>
      %c0_4 = arith.constant 0 : index
      %c0_5 = arith.constant 0 : index
      %13 = vector.load %arg9[%c0_4, %c0_5] : memref<16x128xf32, #tpu.memory_space<vmem>>, vector<16x128xf32>
      %cst = arith.constant dense<0.000000e+00> : vector<16x128xf32>
      %14 = tpu.matmul %12, %13, %cst {dimension_numbers = #tpu.dot_dimension_numbers<[1], [0], [0], [1], [0, 0, 1, 1], [], []>} : vector<16x16xf32>, vector<16x128xf32>, vector<16x128xf32> -> vector<16x128xf32>
      %c0_6 = arith.constant 0 : index
      %c0_7 = arith.constant 0 : index
      %15 = vector.load %arg5[%c0_6, %c0_7] : memref<1x128xf32, #tpu.memory_space<vmem>>, vector<1x128xf32>
      %16 = vector.broadcast %15 : vector<1x128xf32> to vector<16x128xf32>
      %17 = arith.addf %14, %16 : vector<16x128xf32>
      %cst_8 = arith.constant 0.000000e+00 : f32
      %18 = vector.broadcast %cst_8 : f32 to vector<16x128xf32>
      %19 = arith.maximumf %17, %18 : vector<16x128xf32>
      %c0_9 = arith.constant 0 : index
      %c0_10 = arith.constant 0 : index
      %20 = vector.load %arg6[%c0_9, %c0_10] : memref<128x128xf32, #tpu.memory_space<vmem>>, vector<128x128xf32>
      %cst_11 = arith.constant dense<0.000000e+00> : vector<16x128xf32>
      %21 = tpu.matmul %19, %20, %cst_11 {dimension_numbers = #tpu.dot_dimension_numbers<[1], [0], [0], [1], [0, 0, 1, 1], [], []>} : vector<16x128xf32>, vector<128x128xf32>, vector<16x128xf32> -> vector<16x128xf32>
      %22 = arith.index_cast %1 : i32 to index
      %c0_12 = arith.constant 0 : index
      %23 = vector.load %arg10[%22, %c0_12] : memref<16x128xf32, #tpu.memory_space<vmem>>, vector<16x128xf32>
      tpu.vector_store %arg10[%22, %c0_12], %21 {strides = array<i32>} : memref<16x128xf32, #tpu.memory_space<vmem>>, vector<16x128xf32>,
    } else {
    }
    %c2_i32 = arith.constant 2 : i32
    %8 = arith.cmpi eq, %arg0, %c2_i32 : i32
    %9 = arith.extui %8 : i1 to i32
    %c0_i32_2 = arith.constant 0 : i32
    %10 = arith.cmpi ne, %9, %c0_i32_2 : i32
    scf.if %10 {
      %c0 = arith.constant 0 : index
      %c0_3 = arith.constant 0 : index
      %11 = vector.load %arg2[%c0, %c0_3] : memref<16x16xbf16, #tpu.memory_space<vmem>>, vector<16x16xbf16>
      %12 = arith.extf %11 : vector<16x16xbf16> to vector<16x16xf32>
      %c0_4 = arith.constant 0 : index
      %c0_5 = arith.constant 0 : index
      %13 = vector.load %arg10[%c0_4, %c0_5] : memref<16x128xf32, #tpu.memory_space<vmem>>, vector<16x128xf32>
      %cst = arith.constant dense<0.000000e+00> : vector<16x128xf32>
      %14 = tpu.matmul %12, %13, %cst {dimension_numbers = #tpu.dot_dimension_numbers<[1], [0], [0], [1], [0, 0, 1, 1], [], []>} : vector<16x16xf32>, vector<16x128xf32>, vector<16x128xf32> -> vector<16x128xf32>
      %c0_6 = arith.constant 0 : index
      %c0_7 = arith.constant 0 : index
      %15 = vector.load %arg7[%c0_6, %c0_7] : memref<1x128xf32, #tpu.memory_space<vmem>>, vector<1x128xf32>
      %16 = vector.broadcast %15 : vector<1x128xf32> to vector<16x128xf32>
      %17 = arith.addf %14, %16 : vector<16x128xf32>
      %c0_8 = arith.constant 0 : index
      %c0_9 = arith.constant 0 : index
      %18 = vector.load %arg8[%c0_8, %c0_9] : memref<16x128xf32, #tpu.memory_space<vmem>>, vector<16x128xf32>
      tpu.vector_store %arg8[%c0_8, %c0_9], %17 {strides = array<i32>} : memref<16x128xf32, #tpu.memory_space<vmem>>, vector<16x128xf32>,
    } else {
    }
    return
  }
  func.func @transform_0(%arg0: i32, %arg1: i32) -> (i32, i32) {
    %c1_i32 = arith.constant 1 : i32
    %0 = arith.minsi %arg0, %c1_i32 : i32
    %1 = arith.muli %arg1, %0 : i32
    %c0_i32 = arith.constant 0 : i32
    %c0_i32_0 = arith.constant 0 : i32
    return %1, %c0_i32 : i32, i32
  }
  func.func @transform_1(%arg0: i32, %arg1: i32) -> (i32, i32) {
    %c1_i32 = arith.constant 1 : i32
    %0 = arith.minsi %arg0, %c1_i32 : i32
    %c1_i32_0 = arith.constant 1 : i32
    %1 = arith.subi %c1_i32_0, %0 : i32
    %2 = arith.muli %arg1, %1 : i32
    %c0_i32 = arith.constant 0 : i32
    %c0_i32_1 = arith.constant 0 : i32
    return %2, %c0_i32 : i32, i32
  }
  func.func @transform_2(%arg0: i32, %arg1: i32) -> (i32, i32) {
    %c0_i32 = arith.constant 0 : i32
    %c0_i32_0 = arith.constant 0 : i32
    %c0_i32_1 = arith.constant 0 : i32
    return %c0_i32, %c0_i32_0 : i32, i32
  }
  func.func @transform_3(%arg0: i32, %arg1: i32) -> (i32, i32) {
    %c0_i32 = arith.constant 0 : i32
    %c0_i32_0 = arith.constant 0 : i32
    %c0_i32_1 = arith.constant 0 : i32
    return %c0_i32, %c0_i32_0 : i32, i32
  }
  func.func @transform_4(%arg0: i32, %arg1: i32) -> (i32, i32) {
    %c0_i32 = arith.constant 0 : i32
    %c0_i32_0 = arith.constant 0 : i32
    %c0_i32_1 = arith.constant 0 : i32
    return %c0_i32, %c0_i32_0 : i32, i32
  }
  func.func @transform_5(%arg0: i32, %arg1: i32) -> (i32, i32) {
    %c0_i32 = arith.constant 0 : i32
    %c0_i32_0 = arith.constant 0 : i32
    %c0_i32_1 = arith.constant 0 : i32
    return %c0_i32, %c0_i32_0 : i32, i32
  }
  func.func @transform_6(%arg0: i32, %arg1: i32) -> (i32, i32) {
    %c1_i32 = arith.constant 1 : i32
    %0 = arith.subi %arg0, %c1_i32 : i32
    %c0_i32 = arith.constant 0 : i32
    %1 = arith.maxsi %0, %c0_i32 : i32
    %2 = arith.muli %arg1, %1 : i32
    %c0_i32_0 = arith.constant 0 : i32
    %c0_i32_1 = arith.constant 0 : i32
    return %2, %c0_i32_0 : i32, i32
  }
}

</mosaic_0001>

<bundles_post_ra>
// kernel: gcn_forward.1
= control target key start
LH: loop header
LB: loop body
LE: loop exit
PB: predicated region body
PF: predicated region fallthrough
CT: control target
= control target key end

     0   :  { %11 = vsyncpa [#allocation5], 0  ;;  %s1024_s0 = inlined_call_operand.vmem [shape: bf16[16,16], index: 0, kind: input, shape index: {}]   ;;  %s1025_s1 = inlined_call_operand.vmem [shape: f32[16,128], index: 1, kind: input, shape index: {}]   ;;  %s1026_s2 = inlined_call_operand.hbm [shape: f32[128,128], index: 2, kind: input, shape index: {}]   ;;  %s1027_s3 = inlined_call_operand.vmem [shape: f32[1,128], index: 3, kind: input, shape index: {}]   ;;  %s1028_s4 = inlined_call_operand.hbm [shape: f32[128,128], index: 4, kind: input, shape index: {}]   ;;  %s1029_s5 = inlined_call_operand.vmem [shape: f32[1,128], index: 5, kind: input, shape index: {}]   ;;  %s1030_s6 = inlined_call_operand.vmem [shape: f32[16,128], index: 6, kind: output, shape index: {}]  }
   0x1   :  { %12 = vsyncpa [#allocation7], 0  ;;  %s937_s21 = smov 0   ;;  %s939_s22 = smov 0  }
   0x2   :  { %s941_s23 = smov 0  }
   0x3 LB: > { %s690_s24 = sadd.s32 4294967295, %s896_s23   ;;  %s30_s25 = sadd.s32 1, %s892_s22  ;;  %s896_s23 = sphi %s941_s23, %s18_s23   ;;  %s892_s22 = sphi %s939_s22, %s1034_s22   ;;  %s888_s21 = sphi %s937_s21, %s1033_s21  }
   0x4   : > { %p32_p0 = scmp.ge.s32.totalorder %s30_s25, 3  ;;  %p694_p1 = scmp.ge.s32.totalorder %s896_s23, 1 }
   0x5   : > { %p219_p2 = scmp.lt.s32.totalorder %s896_s23, 4  ;;  %p962_p4 = scmp.eq.s32.totalorder %s690_s24, 0 }
   0x6   : > { %s1036_s25 = smov (%p32_p0, %s30_s25), 0  ;;  %s230_s30 = sshll.u32 %s1026_s2, 4  ;;  %s231_s30 = int_to_ptr.hbm [resolvable:$true] %s230_s30 }
   0x7   : > { %p958_p3 = pnand %p694_p1, %p219_p2  ;;  %s898_s7 = smov [#allocation4]  }
   0x8   : > { %s232_s8 = sshll.u32 %s898_s7, 4  ;;  %s247_s11 = sshll.u32 %s1028_s4, 4  ;;  %s233_s8 = int_to_ptr.vmem [resolvable:$true] %s232_s8  ;;  %s248_s11 = int_to_ptr.hbm [resolvable:$true] %s247_s11 }
   0x9   : > { %p765_p5 = pneg %p958_p3  ;;  %s899_s12 = smov 128  }
   0xa   : > { %s900_s13 = smov 8   ;;  %s901_s14 = smov [#allocation6]  }
   0xb   : > { %p766_p6 = pnand %p962_p4, %p765_p5  ;;  %s249_s15 = sshll.u32 %s901_s14, 4  ;;  %s250_s15 = int_to_ptr.vmem [resolvable:$true] %s249_s15 }
   0xc   : > { %300 = sbr.rel (%p958_p3) target bundleno = 610 (0x262), region = 44 }
   0xd   : > { %768 = dma.hbm_to_vmem [thread:$0]  (!%p766_p6), %s231_s30, 2048, %s233_s8, [#allocation5], %s899_s12, %s899_s12, %s900_s13  }
   0xe   : > { %771 = dma.hbm_to_vmem [thread:$0]  (!%p766_p6), %s248_s11, 2048, %s250_s15, [#allocation7], %s899_s12, %s899_s12, %s900_s13  }
  0x11   : > { %879 = dma.done.wait (%p962_p4), [#allocation5], 2048  }
  0x12   : > { %881 = vsyncadd (%p962_p4), [#allocation5], 4294965248 }
  0x13   : > { %883 = dma.done.wait (%p962_p4), [#allocation7], 2048  }
  0x14   : > { %885 = vsyncadd (%p962_p4), [#allocation7], 4294965248  ;;  %p704_p7 = scmp.ne.s32.totalorder %s888_s21, 0 }
  0x16   : > { %396 = sbr.rel (%p704_p7) target bundleno = 187 (0xbb), region = 56 }
  0x1b   : > { %v414_v0 = vld [vmem:[#allocation4 + $0x78] sm:$0xff]  ;;  %v413_v1 = vld [vmem:[#allocation4 + $0x70] sm:$0xff]  ;;  %v412_v2 = vld [vmem:[#allocation4 + $0x68] sm:$0xff] }
  0x1c   : > { %415 = vmatpush.msra.mxu0 %v414_v0  ;;  %723 = vmatpush.msra.mxu1 %v414_v0  ;;  %v411_v3 = vld [vmem:[#allocation4 + $0x60] sm:$0xff]  ;;  %v410_v4 = vld [vmem:[#allocation4 + $0x58] sm:$0xff]  ;;  %v409_v5 = vld [vmem:[#allocation4 + $0x50] sm:$0xff] }
  0x1d   : > { %v408_v6 = vld [vmem:[#allocation4 + $0x48] sm:$0xff]  ;;  %v407_v7 = vld [vmem:[#allocation4 + $0x40] sm:$0xff]  ;;  %v406_v8 = vld [vmem:[#allocation4 + $0x38] sm:$0xff] }
  0x1e   : > { %416 = vmatpush.msra.mxu0 %v413_v1  ;;  %724 = vmatpush.msra.mxu1 %v413_v1  ;;  %v405_v9 = vld [vmem:[#allocation4 + $0x30] sm:$0xff]  ;;  %v404_v10 = vld [vmem:[#allocation4 + $0x28] sm:$0xff]  ;;  %v403_v11 = vld [vmem:[#allocation4 + $0x20] sm:$0xff] }
  0x1f   : > { %v402_v12 = vld [vmem:[#allocation4 + $0x18] sm:$0xff]  ;;  %v401_v13 = vld [vmem:[#allocation4 + $0x10] sm:$0xff]  ;;  %v400_v14 = vld [vmem:[#allocation4 + $0x8] sm:$0xff] }
  0x20   : > { %417 = vmatpush.msra.mxu0 %v412_v2  ;;  %725 = vmatpush.msra.mxu1 %v412_v2  ;;  %v399_v15 = vld [vmem:[#allocation4] sm:$0xff]  ;;  %v398_v17 = vld [vmem:[%s1025_s1 + $0x8] sm:$0xff] }
  0x21   : > { %v397_v16 = vld [vmem:[%s1025_s1] sm:$0xff] }
  0x22   : > { %418 = vmatpush.msra.mxu0 %v411_v3  ;;  %726 = vmatpush.msra.mxu1 %v411_v3 }
  0x24   : > { %419 = vmatpush.msra.mxu0 %v410_v4  ;;  %727 = vmatpush.msra.mxu1 %v410_v4 }
  0x26   : > { %420 = vmatpush.msra.mxu0 %v409_v5  ;;  %728 = vmatpush.msra.mxu1 %v409_v5 }
  0x28   : > { %421 = vmatpush.msra.mxu0 %v408_v6  ;;  %729 = vmatpush.msra.mxu1 %v408_v6 }
  0x2a   : > { %422 = vmatpush.msra.mxu0 %v407_v7  ;;  %730 = vmatpush.msra.mxu1 %v407_v7 }
  0x2c   : > { %423 = vmatpush.msra.mxu0 %v406_v8  ;;  %731 = vmatpush.msra.mxu1 %v406_v8 }
  0x2e   : > { %424 = vmatpush.msra.mxu0 %v405_v9  ;;  %732 = vmatpush.msra.mxu1 %v405_v9 }
  0x30   : > { %425 = vmatpush.msra.mxu0 %v404_v10  ;;  %733 = vmatpush.msra.mxu1 %v404_v10 }
  0x32   : > { %426 = vmatpush.msra.mxu0 %v403_v11  ;;  %734 = vmatpush.msra.mxu1 %v403_v11 }
  0x34   : > { %427 = vmatpush.msra.mxu0 %v402_v12  ;;  %735 = vmatpush.msra.mxu1 %v402_v12 }
  0x36   : > { %428 = vmatpush.msra.mxu0 %v401_v13  ;;  %736 = vmatpush.msra.mxu1 %v401_v13 }
  0x38   : > { %429 = vmatpush.msra.mxu0 %v400_v14  ;;  %737 = vmatpush.msra.mxu1 %v400_v14 }
  0x3a   : > { %430 = vmatpush.msra.mxu0 %v399_v15  ;;  %738 = vmatpush.msra.mxu1 %v399_v15 }
  0x3b   : > { %431 = vmatmul.f32.vlgmr.msra.gmra.mxu0 %v397_v16  ;;  %434 = vmatmul.f32.vlgmr.msra.gmra.mxu1 %v398_v17 }
  0xb8   : > { %v432_v18 = vpop.f32.mrf.mxu0  ;;  %v435_v19 = vpop.f32.mrf.mxu1 }
  0xb9   : > { %439 = vst [vmem:[#allocation2] sm:$0xff] %v432_v18 }
  0xba   : > { %440 = vst [vmem:[#allocation2 + $0x8] sm:$0xff] %v435_v19 }
  0xbb PF: > { %p705_p8 = scmp.ne.s32.totalorder %s888_s21, 1 }
  0xbd   : > { %444 = sbr.rel (%p705_p8) target bundleno = 469 (0x1d5), region = 60 }
  0xc2   : > { %v450_v20 = vld [vmem:[#allocation2 + $0x8] sm:$0xff]  ;;  %v449_v21 = vld [vmem:[#allocation2] sm:$0xff]  ;;  %vm455_vm0 = vcmask 130048   ;;  %v502_v24 = vld [vmem:[#allocation6 + $0x78] sm:$0xff] }
  0xc3   : > { %v716_v22 = vld [vmem:[%s1024_s0] sm:$0xff]   ;;  %476 = vmatpush.msra.mxu0 %v450_v20  ;;  %v501_v25 = vld [vmem:[#allocation6 + $0x70] sm:$0xff]  ;;  %503 = vmatpush.msra.mxu1 %v502_v24  ;;  %v500_v26 = vld [vmem:[#allocation6 + $0x68] sm:$0xff] }
  0xc4   : > { %v717_v23 = vunpack.c.l.bf16 %v716_v22  ;;  %739 = vmatpush.msra.mxu2 %v502_v24  ;;  %v499_v27 = vld [vmem:[#allocation6 + $0x60] sm:$0xff]  ;;  %v498_v28 = vld [vmem:[#allocation6 + $0x58] sm:$0xff]  ;;  %v718_v29 = vunpack.c.h.bf16 %v716_v22  ;;  %v497_v30 = vld [vmem:[#allocation6 + $0x50] sm:$0xff] }
  0xc5   : > { %477 = vmatpush.msra.mxu0 %v449_v21  ;;  %504 = vmatpush.msra.mxu1 %v501_v25  ;;  %v496_v31 = vld [vmem:[#allocation6 + $0x48] sm:$0xff]  ;;  %v495_v32 = vld [vmem:[#allocation6 + $0x40] sm:$0xff]  ;;  %v494_v33 = vld [vmem:[#allocation6 + $0x38] sm:$0xff] }
  0xc6   : > { %706 = vmatmul.msk.f32.vlgmr.msra.gmra.mxu0 %vm455_vm0, %v717_v23  ;;  %740 = vmatpush.msra.mxu2 %v501_v25  ;;  %v493_v34 = vld [vmem:[#allocation6 + $0x30] sm:$0xff]  ;;  %v492_v35 = vld [vmem:[#allocation6 + $0x28] sm:$0xff]  ;;  %v491_v36 = vld [vmem:[#allocation6 + $0x20] sm:$0xff] }
  0xc7   : > { %505 = vmatpush.msra.mxu1 %v500_v26  ;;  %v490_v37 = vld [vmem:[#allocation6 + $0x18] sm:$0xff]  ;;  %v489_v38 = vld [vmem:[#allocation6 + $0x10] sm:$0xff]  ;;  %v488_v39 = vld [vmem:[#allocation6 + $0x8] sm:$0xff] }
  0xc8   : > { %741 = vmatpush.msra.mxu2 %v500_v26  ;;  %v487_v40 = vld [vmem:[#allocation6] sm:$0xff] }
  0xc9   : > { %506 = vmatpush.msra.mxu1 %v499_v27  ;;  %v804_v41 = vld [vmem:[%s1027_s3] ss:$0 sm:$0xff] }
  0xca   : > { %742 = vmatpush.msra.mxu2 %v499_v27 }
  0xcb   : > { %507 = vmatpush.msra.mxu1 %v498_v28 }
  0xcc   : > { %743 = vmatpush.msra.mxu2 %v498_v28 }
  0xcd   : > { %508 = vmatpush.msra.mxu1 %v497_v30 }
  0xce   : > { %707 = vmatmul.msk.f32.gmra.mxu0 %vm455_vm0, %v718_v29  ;;  %744 = vmatpush.msra.mxu2 %v497_v30 }
  0xcf   : > { %509 = vmatpush.msra.mxu1 %v496_v31 }
  0xd0   : > { %745 = vmatpush.msra.mxu2 %v496_v31 }
  0xd1   : > { %510 = vmatpush.msra.mxu1 %v495_v32 }
  0xd2   : > { %746 = vmatpush.msra.mxu2 %v495_v32 }
  0xd3   : > { %511 = vmatpush.msra.mxu1 %v494_v33 }
  0xd4   : > { %747 = vmatpush.msra.mxu2 %v494_v33 }
  0xd5   : > { %512 = vmatpush.msra.mxu1 %v493_v34 }
  0xd6   : > { %748 = vmatpush.msra.mxu2 %v493_v34 }
  0xd7   : > { %513 = vmatpush.msra.mxu1 %v492_v35 }
  0xd8   : > { %749 = vmatpush.msra.mxu2 %v492_v35 }
  0xd9   : > { %514 = vmatpush.msra.mxu1 %v491_v36 }
  0xda   : > { %750 = vmatpush.msra.mxu2 %v491_v36 }
  0xdb   : > { %515 = vmatpush.msra.mxu1 %v490_v37 }
  0xdc   : > { %751 = vmatpush.msra.mxu2 %v490_v37 }
  0xdd   : > { %516 = vmatpush.msra.mxu1 %v489_v38 }
  0xde   : > { %752 = vmatpush.msra.mxu2 %v489_v38 }
  0xdf   : > { %517 = vmatpush.msra.mxu1 %v488_v39 }
  0xe0   : > { %753 = vmatpush.msra.mxu2 %v488_v39 }
  0xe1   : > { %518 = vmatpush.msra.mxu1 %v487_v40 }
  0xe2   : > { %754 = vmatpush.msra.mxu2 %v487_v40 }
 0x143   : > { %v479_v42 = vpop.f32.mrf.mxu0 }
 0x144   : > { %v480_v43 = vadd.f32 %v804_v41, %v479_v42 }
 0x146   : > { %v485_v44 = vmax.f32 %v480_v43, 0.0 }
 0x148   : > { %519 = vmatmul.f32.vlgmr.msra.gmra.mxu1 %v485_v44 }
 0x14b   : > { %v482_v45 = vpop.f32.mrf.mxu0 }
 0x14c   : > { %v483_v46 = vadd.f32 %v804_v41, %v482_v45 }
 0x14e   : > { %v486_v47 = vmax.f32 %v483_v46, 0.0 }
 0x150   : > { %522 = vmatmul.f32.vlgmr.msra.gmra.mxu2 %v486_v47 }
 0x1c5   : > { %v520_v48 = vpop.f32.mrf.mxu1 }
 0x1c6   : > { %527 = vst [vmem:[#allocation3 + $0x8] sm:$0xff] %v520_v48 }
 0x1d3   : > { %v523_v49 = vpop.f32.mrf.mxu2 }
 0x1d4   : > { %528 = vst [vmem:[#allocation3] sm:$0xff] %v523_v49 }
 0x1d5 PF: > { %p708_p9 = scmp.ne.s32.totalorder %s888_s21, 2 }
 0x1d7   : > { %532 = sbr.rel (%p708_p9) target bundleno = 610 (0x262), region = 64 }
 0x1dc   : > { %v538_v50 = vld [vmem:[#allocation3] sm:$0xff]  ;;  %v537_v51 = vld [vmem:[#allocation3 + $0x8] sm:$0xff]  ;;  %v720_v52 = vld [vmem:[%s1024_s0] sm:$0xff]   ;;  %vm543_vm1 = vcmask 130048  }
 0x1dd   : > { %564 = vmatpush.msra.mxu0 %v538_v50  ;;  %755 = vmatpush.msra.mxu1 %v538_v50  ;;  %v721_v53 = vunpack.c.l.bf16 %v720_v52  ;;  %v722_v54 = vunpack.c.h.bf16 %v720_v52  ;;  %v805_v55 = vld [vmem:[%s1029_s5] ss:$0 sm:$0xff] }
 0x1df   : > { %565 = vmatpush.msra.mxu0 %v537_v51  ;;  %756 = vmatpush.msra.mxu1 %v537_v51 }
 0x1e0   : > { %709 = vmatmul.msk.f32.vlgmr.msra.gmra.mxu0 %vm543_vm1, %v721_v53  ;;  %710 = vmatmul.msk.f32.vlgmr.msra.gmra.mxu1 %vm543_vm1, %v722_v54 }
 0x25d   : > { %v567_v56 = vpop.f32.mrf.mxu0  ;;  %v570_v57 = vpop.f32.mrf.mxu1 }
 0x25e   : > { %v568_v58 = vadd.f32 %v805_v55, %v567_v56  ;;  %v571_v59 = vadd.f32 %v805_v55, %v570_v57 }
 0x260   : > { %573 = vst [vmem:[%s1030_s6] sm:$0xff] %v568_v58 }
 0x261   : > { %574 = vst [vmem:[%s1030_s6 + $0x8] sm:$0xff] %v571_v59 }
 0x262 PF: > { %s18_s23 = sadd.s32 1, %s896_s23   ;;  %s1033_s21 = smov %s892_s22 }
 0x263   : > { %p15_p10 = scmp.ge.s32.totalorder %s18_s23, 5   ;;  %s1034_s22 = smov %s1036_s25 }
 0x265   :  { %17 = sbr.rel (!%p15_p10) target bundleno = 3 (0x3), region = 100 }
 0x26a   :  { %609 = vsyncpa [#allocation5], 1 }
 0x26b   :  { %611 = vsyncpa [#allocation5 + $0x1], 1 }
 0x26c   :  { %612 = vsyncpa [#allocation7], 1 }

</bundles_post_ra>
